<compile_context>
chip_gen: v7x
topology: tpu7x:2x2x1
jax: 0.10.0
libtpu: 0.0.40
codegen_flags: <defaults>
</compile_context>

<pallas_src>
import jax
import jax.numpy as jnp
from jax.experimental import pallas as pl
from jax.experimental.pallas import tpu as pltpu


def dqn_mlp_kernel(x_ref, w1_ref, b1_ref, w2_ref, b2_ref, w3_ref, b3_ref, o_ref):
    # x_ref: (TB, F) f32    w1: (F, 24) bf16   b1: (1, 24) f32
    # w2: (24, 32) f32      b2: (1, 32) f32
    # w3: (32, 2)  f32      b3: (1, 2)  f32    o: (TB, 2) f32
    # Cast x to bf16 in-kernel (HBM read stays f32, MXU runs bf16, f32 accum).
    x = x_ref[...].astype(jnp.bfloat16)

    h1 = jnp.dot(x, w1_ref[...], preferred_element_type=jnp.float32) + b1_ref[...]
    h1 = jnp.maximum(h1, 0.0)

    h2 = jnp.dot(h1, w2_ref[...], preferred_element_type=jnp.float32) + b2_ref[...]
    h2 = jnp.maximum(h2, 0.0)

    out = jnp.dot(h2, w3_ref[...], preferred_element_type=jnp.float32) + b3_ref[...]
    o_ref[...] = out.astype(o_ref.dtype)


def _cdiv(a, b):
    return (a + b - 1) // b


def _round_up(n, m):
    return _cdiv(n, m) * m


_X_DBUF_BUDGET = 24 << 20   # VMEM budget for the double-buffered f32 x stream
_VMEM_LIMIT = 40 << 20      # explicit scoped-VMEM limit (safe on v5e/v6e/v7x)


def _pick_batch_tile(B, F_in, tb_max):
    """Pick a 16-row-aligned batch tile that amortizes grid-step overhead
    while keeping padding slack small and the x double-buffer within budget."""
    cap = (_X_DBUF_BUDGET // (2 * F_in * 4)) // 16 * 16
    tb_max = max(16, min(tb_max, max(cap, 16)))
    n_tiles = _cdiv(B, tb_max)
    tb = _round_up(_cdiv(B, n_tiles), 16)
    b_pad = _round_up(B, tb)
    return tb, b_pad


def prepare_params(params):
    """One-time preprocessing (casts / bias reshapes) hoisted out of the
    per-step forward so no extra HLO is emitted per call."""
    return {
        "w1": params["w1"].astype(jnp.bfloat16),
        "b1": params["b1"].reshape(1, -1).astype(jnp.float32),
        "w2": params["w2"].astype(jnp.float32),
        "b2": params["b2"].reshape(1, -1).astype(jnp.float32),
        "w3": params["w3"].astype(jnp.float32),
        "b3": params["b3"].reshape(1, -1).astype(jnp.float32),
    }


def dqn_forward(x_nchw, prepared, *, tb_max=2048):
    """Forward pass of the DQN MLP.

    x_nchw:   (B, 3, H, W) float32
    prepared: output of prepare_params()
    returns:  (B, 2) float32
    """
    B = x_nchw.shape[0]
    # Flatten exactly like torch's t.flatten(start_dim=1): row-major over (C,H,W).
    x = x_nchw.reshape(B, -1).astype(jnp.float32)
    F_in = x.shape[1]

    TB, B_pad = _pick_batch_tile(B, F_in, tb_max)
    if B_pad != B:
        x = jnp.pad(x, ((0, B_pad - B), (0, 0)))  # at most TB-1 (<= small) rows

    w1, b1 = prepared["w1"], prepared["b1"]
    w2, b2 = prepared["w2"], prepared["b2"]
    w3, b3 = prepared["w3"], prepared["b3"]

    flops = 2 * B_pad * (F_in * 24 + 24 * 32 + 32 * 2)
    bytes_accessed = (
        B_pad * F_in * 4                        # x (f32 read)
        + F_in * 24 * 2                         # w1 (bf16)
        + (24 + 24 * 32 + 32 + 32 * 2 + 2) * 4  # small weights/biases (f32)
        + B_pad * 2 * 4                         # output (f32)
    )

    out = pl.pallas_call(
        dqn_mlp_kernel,
        out_shape=jax.ShapeDtypeStruct((B_pad, 2), jnp.float32),
        grid=(B_pad // TB,),
        in_specs=[
            pl.BlockSpec((TB, F_in), lambda i: (i, 0)),   # x: tiled over batch
            pl.BlockSpec((F_in, 24), lambda i: (0, 0)),   # weights stay resident
            pl.BlockSpec((1, 24), lambda i: (0, 0)),
            pl.BlockSpec((24, 32), lambda i: (0, 0)),
            pl.BlockSpec((1, 32), lambda i: (0, 0)),
            pl.BlockSpec((32, 2), lambda i: (0, 0)),
            pl.BlockSpec((1, 2), lambda i: (0, 0)),
        ],
        out_specs=pl.BlockSpec((TB, 2), lambda i: (i, 0)),
        compiler_params=pltpu.CompilerParams(
            dimension_semantics=("parallel",),
            vmem_limit_bytes=_VMEM_LIMIT,
        ),
        cost_estimate=pl.CostEstimate(
            flops=flops, transcendentals=0, bytes_accessed=bytes_accessed
        ),
    )(x, w1, b1, w2, b2, w3, b3)

    return out[:B]


def init_params(key, img_height, img_width):
    """Deterministic init mimicking nn.Linear default (uniform +-1/sqrt(fan_in))."""
    F_in = img_height * img_width * 3
    keys = jax.random.split(key, 6)

    def lin(kw, kb, fan_in, fan_out):
        bound = 1.0 / jnp.sqrt(jnp.float32(fan_in))
        w = jax.random.uniform(kw, (fan_in, fan_out), jnp.float32, -bound, bound)
        b = jax.random.uniform(kb, (fan_out,), jnp.float32, -bound, bound)
        return w, b

    w1, b1 = lin(keys[0], keys[1], F_in, 24)
    w2, b2 = lin(keys[2], keys[3], 24, 32)
    w3, b3 = lin(keys[4], keys[5], 32, 2)
    return {"w1": w1, "b1": b1, "w2": w2, "b2": b2, "w3": w3, "b3": b3}


def reference_forward(x_nchw, params):
    x = x_nchw.reshape(x_nchw.shape[0], -1).astype(jnp.float32)
    h1 = jnp.maximum(x @ params["w1"] + params["b1"], 0.0)
    h2 = jnp.maximum(h1 @ params["w2"] + params["b2"], 0.0)
    return h2 @ params["w3"] + params["b3"]


if __name__ == "__main__":
    key = jax.random.PRNGKey(0)
    k_x, k_p = jax.random.split(key)

    B, C, H, W = 2, 3, 16, 16  # DQN expects 3 channels: in_features = H*W*3
    x = jax.random.normal(k_x, (B, C, H, W), dtype=jnp.float32)
    params = init_params(k_p, H, W)
    prepared = prepare_params(params)

    out = dqn_forward(x, prepared)
    out = jax.block_until_ready(out)

    ref = reference_forward(x, params)
    assert out.shape == (B, 2)
    # bf16 MXU inputs -> looser tolerance than a pure-f32 matmul.
    assert jnp.allclose(out, ref, atol=2e-2, rtol=2e-2), (out, ref)

    print("KERNEL_OK")
</pallas_src>

<mosaic_0001>
module attributes {stable_mosaic.version = 11 : i64} {
  func.func @dqn_mlp_kernel(%arg0: i32, %arg1: memref<16x768xf32, #tpu.memory_space<vmem>>, %arg2: memref<768x24xbf16, #tpu.memory_space<vmem>>, %arg3: memref<1x24xf32, #tpu.memory_space<vmem>>, %arg4: memref<24x32xf32, #tpu.memory_space<vmem>>, %arg5: memref<1x32xf32, #tpu.memory_space<vmem>>, %arg6: memref<32x2xf32, #tpu.memory_space<vmem>>, %arg7: memref<1x2xf32, #tpu.memory_space<vmem>>, %arg8: memref<16x2xf32, #tpu.memory_space<vmem>>) attributes {dimension_semantics = [#tpu.dimension_semantics<parallel>], iteration_bounds = array<i64: 1>, scalar_prefetch = 0 : i64, scratch_operands = 0 : i64, tpu.core_type = #tpu.core_type<tc>, window_params = [{transform_indices = @transform_0, window_bounds = array<i64: 16, 768>}, {pipeline_mode = #tpu.pipeline_mode<synchronous>, transform_indices = @transform_1, window_bounds = array<i64: 768, 24>}, {pipeline_mode = #tpu.pipeline_mode<synchronous>, transform_indices = @transform_2, window_bounds = array<i64: 1, 24>}, {pipeline_mode = #tpu.pipeline_mode<synchronous>, transform_indices = @transform_3, window_bounds = array<i64: 24, 32>}, {pipeline_mode = #tpu.pipeline_mode<synchronous>, transform_indices = @transform_4, window_bounds = array<i64: 1, 32>}, {pipeline_mode = #tpu.pipeline_mode<synchronous>, transform_indices = @transform_5, window_bounds = array<i64: 32, 2>}, {pipeline_mode = #tpu.pipeline_mode<synchronous>, transform_indices = @transform_6, window_bounds = array<i64: 1, 2>}, {transform_indices = @transform_7, window_bounds = array<i64: 16, 2>}]} {
    %c0 = arith.constant 0 : index
    %c0_0 = arith.constant 0 : index
    %0 = vector.load %arg1[%c0, %c0_0] : memref<16x768xf32, #tpu.memory_space<vmem>>, vector<16x768xf32>
    %1 = arith.truncf %0 : vector<16x768xf32> to vector<16x768xbf16>
    %c0_1 = arith.constant 0 : index
    %c0_2 = arith.constant 0 : index
    %2 = vector.load %arg2[%c0_1, %c0_2] : memref<768x24xbf16, #tpu.memory_space<vmem>>, vector<768x24xbf16>
    %cst = arith.constant dense<0.000000e+00> : vector<16x24xf32>
    %3 = tpu.matmul %1, %2, %cst {dimension_numbers = #tpu.dot_dimension_numbers<[1], [0], [0], [1], [0, 0, 1, 1], [], []>} : vector<16x768xbf16>, vector<768x24xbf16>, vector<16x24xf32> -> vector<16x24xf32>
    %c0_3 = arith.constant 0 : index
    %c0_4 = arith.constant 0 : index
    %4 = vector.load %arg3[%c0_3, %c0_4] : memref<1x24xf32, #tpu.memory_space<vmem>>, vector<1x24xf32>
    %5 = vector.broadcast %4 : vector<1x24xf32> to vector<16x24xf32>
    %6 = arith.addf %3, %5 : vector<16x24xf32>
    %cst_5 = arith.constant 0.000000e+00 : f32
    %7 = vector.broadcast %cst_5 : f32 to vector<16x24xf32>
    %8 = arith.maximumf %6, %7 : vector<16x24xf32>
    %c0_6 = arith.constant 0 : index
    %c0_7 = arith.constant 0 : index
    %9 = vector.load %arg4[%c0_6, %c0_7] : memref<24x32xf32, #tpu.memory_space<vmem>>, vector<24x32xf32>
    %cst_8 = arith.constant dense<0.000000e+00> : vector<16x32xf32>
    %10 = tpu.matmul %8, %9, %cst_8 {dimension_numbers = #tpu.dot_dimension_numbers<[1], [0], [0], [1], [0, 0, 1, 1], [], []>} : vector<16x24xf32>, vector<24x32xf32>, vector<16x32xf32> -> vector<16x32xf32>
    %c0_9 = arith.constant 0 : index
    %c0_10 = arith.constant 0 : index
    %11 = vector.load %arg5[%c0_9, %c0_10] : memref<1x32xf32, #tpu.memory_space<vmem>>, vector<1x32xf32>
    %12 = vector.broadcast %11 : vector<1x32xf32> to vector<16x32xf32>
    %13 = arith.addf %10, %12 : vector<16x32xf32>
    %cst_11 = arith.constant 0.000000e+00 : f32
    %14 = vector.broadcast %cst_11 : f32 to vector<16x32xf32>
    %15 = arith.maximumf %13, %14 : vector<16x32xf32>
    %c0_12 = arith.constant 0 : index
    %c0_13 = arith.constant 0 : index
    %16 = vector.load %arg6[%c0_12, %c0_13] : memref<32x2xf32, #tpu.memory_space<vmem>>, vector<32x2xf32>
    %cst_14 = arith.constant dense<0.000000e+00> : vector<16x2xf32>
    %17 = tpu.matmul %15, %16, %cst_14 {dimension_numbers = #tpu.dot_dimension_numbers<[1], [0], [0], [1], [0, 0, 1, 1], [], []>} : vector<16x32xf32>, vector<32x2xf32>, vector<16x2xf32> -> vector<16x2xf32>
    %c0_15 = arith.constant 0 : index
    %c0_16 = arith.constant 0 : index
    %18 = vector.load %arg7[%c0_15, %c0_16] : memref<1x2xf32, #tpu.memory_space<vmem>>, vector<1x2xf32>
    %19 = vector.broadcast %18 : vector<1x2xf32> to vector<16x2xf32>
    %20 = arith.addf %17, %19 : vector<16x2xf32>
    %c0_17 = arith.constant 0 : index
    %c0_18 = arith.constant 0 : index
    %21 = vector.load %arg8[%c0_17, %c0_18] : memref<16x2xf32, #tpu.memory_space<vmem>>, vector<16x2xf32>
    tpu.vector_store %arg8[%c0_17, %c0_18], %20 {strides = array<i32>} : memref<16x2xf32, #tpu.memory_space<vmem>>, vector<16x2xf32>,
    return
  }
  func.func @transform_0(%arg0: i32) -> (i32, i32) {
    %c0_i32 = arith.constant 0 : i32
    %c0_i32_0 = arith.constant 0 : i32
    return %arg0, %c0_i32 : i32, i32
  }
  func.func @transform_1(%arg0: i32) -> (i32, i32) {
    %c0_i32 = arith.constant 0 : i32
    %c0_i32_0 = arith.constant 0 : i32
    %c0_i32_1 = arith.constant 0 : i32
    return %c0_i32, %c0_i32_0 : i32, i32
  }
  func.func @transform_2(%arg0: i32) -> (i32, i32) {
    %c0_i32 = arith.constant 0 : i32
    %c0_i32_0 = arith.constant 0 : i32
    %c0_i32_1 = arith.constant 0 : i32
    return %c0_i32, %c0_i32_0 : i32, i32
  }
  func.func @transform_3(%arg0: i32) -> (i32, i32) {
    %c0_i32 = arith.constant 0 : i32
    %c0_i32_0 = arith.constant 0 : i32
    %c0_i32_1 = arith.constant 0 : i32
    return %c0_i32, %c0_i32_0 : i32, i32
  }
  func.func @transform_4(%arg0: i32) -> (i32, i32) {
    %c0_i32 = arith.constant 0 : i32
    %c0_i32_0 = arith.constant 0 : i32
    %c0_i32_1 = arith.constant 0 : i32
    return %c0_i32, %c0_i32_0 : i32, i32
  }
  func.func @transform_5(%arg0: i32) -> (i32, i32) {
    %c0_i32 = arith.constant 0 : i32
    %c0_i32_0 = arith.constant 0 : i32
    %c0_i32_1 = arith.constant 0 : i32
    return %c0_i32, %c0_i32_0 : i32, i32
  }
  func.func @transform_6(%arg0: i32) -> (i32, i32) {
    %c0_i32 = arith.constant 0 : i32
    %c0_i32_0 = arith.constant 0 : i32
    %c0_i32_1 = arith.constant 0 : i32
    return %c0_i32, %c0_i32_0 : i32, i32
  }
  func.func @transform_7(%arg0: i32) -> (i32, i32) {
    %c0_i32 = arith.constant 0 : i32
    %c0_i32_0 = arith.constant 0 : i32
    return %arg0, %c0_i32 : i32, i32
  }
}

</mosaic_0001>

<bundles_post_ra>
// kernel: tpu_custom_call.1
= control target key start
LH: loop header
LB: loop body
LE: loop exit
PB: predicated region body
PF: predicated region fallthrough
CT: control target
= control target key end

     0   :  { %vm571_vm0 = vcmask 195584   ;;  %vm666_vm1 = vcmask 261120   ;;  %vm748_vm2 = vcmask 15360   ;;  %s1223_s1 = inlined_call_operand.vmem [shape: bf16[768,24], index: 1, kind: input, shape index: {}]   ;;  %s1224_s0 = inlined_call_operand.vmem [shape: f32[16,768], index: 0, kind: input, shape index: {}]   ;;  %s1225_s3 = inlined_call_operand.vmem [shape: f32[24,32], index: 3, kind: input, shape index: {}]   ;;  %s1226_s5 = inlined_call_operand.vmem [shape: f32[32,2], index: 5, kind: input, shape index: {}]   ;;  %s1227_s2 = inlined_call_operand.vmem [shape: f32[1,24], index: 2, kind: input, shape index: {}]   ;;  %s1228_s4 = inlined_call_operand.vmem [shape: f32[1,32], index: 4, kind: input, shape index: {}]   ;;  %s1229_s6 = inlined_call_operand.vmem [shape: f32[1,2], index: 6, kind: input, shape index: {}]   ;;  %s1230_s7 = inlined_call_operand.vmem [shape: f32[16,2], index: 7, kind: output, shape index: {}]  }
   0x1   :  { %v919_v0 = vld [vmem:[%s1223_s1 + $0x40] sm:$0xff]   ;;  %v923_v4 = vld [vmem:[%s1223_s1 + $0x48] sm:$0xff]   ;;  %v927_v8 = vld [vmem:[%s1223_s1 + $0x50] sm:$0xff]  }
   0x2   :  { %v920_v1 = vld [vmem:[%s1223_s1] sm:$0xff]   ;;  %810 = vmatprep.subr.bf16.mxu0 %v919_v0  ;;  %v924_v5 = vld [vmem:[%s1223_s1 + $0x8] sm:$0xff]   ;;  %v928_v9 = vld [vmem:[%s1223_s1 + $0x10] sm:$0xff]  }
   0x3   :  { %v921_v2 = vld [vmem:[%s1223_s1 + $0xc0] sm:$0xff]   ;;  %811 = vmatpush3.bf16.msra.mxu0 %v920_v1  ;;  %v925_v6 = vld [vmem:[%s1223_s1 + $0xc8] sm:$0xff]   ;;  %v929_v10 = vld [vmem:[%s1223_s1 + $0xd0] sm:$0xff]  }
   0x4   :  { %v922_v3 = vld [vmem:[%s1223_s1 + $0x80] sm:$0xff]   ;;  %832 = vmatprep.subr.bf16.mxu1 %v921_v2  ;;  %812 = vmatprep.subr.bf16.mxu0 %v923_v4  ;;  %v926_v7 = vld [vmem:[%s1223_s1 + $0x88] sm:$0xff]   ;;  %v930_v11 = vld [vmem:[%s1223_s1 + $0x90] sm:$0xff]  }
   0x5   :  { %833 = vmatpush3.bf16.msra.mxu1 %v922_v3  ;;  %v931_v12 = vld [vmem:[%s1223_s1 + $0x58] sm:$0xff]   ;;  %v935_v16 = vld [vmem:[%s1223_s1 + $0x60] sm:$0xff]   ;;  %v939_v20 = vld [vmem:[%s1223_s1 + $0x68] sm:$0xff]  }
   0x6   :  { %834 = vmatprep.subr.bf16.mxu1 %v925_v6  ;;  %v932_v13 = vld [vmem:[%s1223_s1 + $0x18] sm:$0xff]   ;;  %v936_v17 = vld [vmem:[%s1223_s1 + $0x20] sm:$0xff]   ;;  %v940_v21 = vld [vmem:[%s1223_s1 + $0x28] sm:$0xff]  }
   0x7   :  { %813 = vmatpush3.bf16.msra.mxu0 %v924_v5  ;;  %v933_v14 = vld [vmem:[%s1223_s1 + $0xd8] sm:$0xff]   ;;  %v937_v18 = vld [vmem:[%s1223_s1 + $0xe0] sm:$0xff]   ;;  %v941_v22 = vld [vmem:[%s1223_s1 + $0xe8] sm:$0xff]  }
   0x8   :  { %814 = vmatprep.subr.bf16.mxu0 %v927_v8  ;;  %v934_v15 = vld [vmem:[%s1223_s1 + $0x98] sm:$0xff]   ;;  %v938_v19 = vld [vmem:[%s1223_s1 + $0xa0] sm:$0xff]   ;;  %v942_v23 = vld [vmem:[%s1223_s1 + $0xa8] sm:$0xff]  }
   0x9   :  { %835 = vmatpush3.bf16.msra.mxu1 %v926_v7  ;;  %v943_v24 = vld [vmem:[%s1223_s1 + $0x70] sm:$0xff]   ;;  %v947_v28 = vld [vmem:[%s1223_s1 + $0x78] sm:$0xff]   ;;  %v28_v31 = vld [vmem:[%s1224_s0 + $0x8] sm:$0xff] }
   0xa   :  { %836 = vmatprep.subr.bf16.mxu1 %v929_v10  ;;  %v944_v25 = vld [vmem:[%s1223_s1 + $0x30] sm:$0xff]   ;;  %v948_v29 = vld [vmem:[%s1223_s1 + $0x38] sm:$0xff]   ;;  %v27_v35 = vld [vmem:[%s1224_s0] sm:$0xff] }
   0xb   :  { %815 = vmatpush3.bf16.msra.mxu0 %v928_v9  ;;  %v945_v26 = vld [vmem:[%s1223_s1 + $0xf0] sm:$0xff]   ;;  %v949_v30 = vld [vmem:[%s1223_s1 + $0xf8] sm:$0xff]   ;;  %v951_v38 = vld [vmem:[%s1223_s1 + $0x140] sm:$0xff]  }
   0xc   :  { %816 = vmatprep.subr.bf16.mxu0 %v931_v12  ;;  %v946_v27 = vld [vmem:[%s1223_s1 + $0xb0] sm:$0xff]   ;;  %v34_v32 = vld [vmem:[%s1224_s0 + $0x38] sm:$0xff]  ;;  %v36_v40 = vld [vmem:[%s1224_s0 + $0x48] sm:$0xff] }
   0xd   :  { %837 = vmatpush3.bf16.msra.mxu1 %v930_v11  ;;  %v40_v33 = vpack.c.bf16 %v34_v32, %v28_v31  ;;  %v950_v34 = vld [vmem:[%s1223_s1 + $0xb8] sm:$0xff]   ;;  %v33_v36 = vld [vmem:[%s1224_s0 + $0x30] sm:$0xff]  ;;  %v952_v42 = vld [vmem:[%s1223_s1 + $0x100] sm:$0xff]  }
   0xe   :  { %838 = vmatprep.subr.bf16.mxu1 %v933_v14  ;;  %v39_v37 = vpack.c.bf16 %v33_v36, %v27_v35  ;;  %v30_v39 = vld [vmem:[%s1224_s0 + $0x18] sm:$0xff]  ;;  %v29_v43 = vld [vmem:[%s1224_s0 + $0x10] sm:$0xff]  ;;  %v35_v44 = vld [vmem:[%s1224_s0 + $0x40] sm:$0xff] }
   0xf   :  { %817 = vmatpush3.bf16.msra.mxu0 %v932_v13  ;;  %468 = vmatprep.mubr.bf16.mxu0 %v40_v33  ;;  %v42_v41 = vpack.c.bf16 %v36_v40, %v30_v39  ;;  %v41_v45 = vpack.c.bf16 %v35_v44, %v29_v43  ;;  %v953_v46 = vld [vmem:[%s1223_s1 + $0x148] sm:$0xff]   ;;  %v955_v48 = vld [vmem:[%s1223_s1 + $0x150] sm:$0xff]   ;;  %v957_v50 = vld [vmem:[%s1223_s1 + $0x158] sm:$0xff]  }
  0x10   :  { %818 = vmatprep.subr.bf16.mxu0 %v935_v16  ;;  %v954_v47 = vld [vmem:[%s1223_s1 + $0x108] sm:$0xff]   ;;  %v956_v49 = vld [vmem:[%s1223_s1 + $0x110] sm:$0xff]   ;;  %v958_v51 = vld [vmem:[%s1223_s1 + $0x118] sm:$0xff]  }
  0x11   :  { %839 = vmatpush3.bf16.msra.mxu1 %v934_v15  ;;  %509 = vmatprep.mubr.bf16.mxu1 %v42_v41  ;;  %v959_v52 = vld [vmem:[%s1223_s1 + $0x160] sm:$0xff]   ;;  %v961_v54 = vld [vmem:[%s1223_s1 + $0x168] sm:$0xff]   ;;  %v38_v56 = vld [vmem:[%s1224_s0 + $0x58] sm:$0xff] }
  0x12   :  { %840 = vmatprep.subr.bf16.mxu1 %v937_v18  ;;  %v960_v53 = vld [vmem:[%s1223_s1 + $0x120] sm:$0xff]   ;;  %v32_v55 = vld [vmem:[%s1224_s0 + $0x28] sm:$0xff]  ;;  %v963_v59 = vld [vmem:[%s1223_s1 + $0x170] sm:$0xff]  }
  0x13   :  { %819 = vmatpush3.bf16.msra.mxu0 %v936_v17  ;;  %v44_v57 = vpack.c.bf16 %v38_v56, %v32_v55  ;;  %v962_v58 = vld [vmem:[%s1223_s1 + $0x128] sm:$0xff]   ;;  %v964_v60 = vld [vmem:[%s1223_s1 + $0x130] sm:$0xff]   ;;  %v965_v61 = vld [vmem:[%s1223_s1 + $0x178] sm:$0xff]  }
  0x14   :  { %820 = vmatprep.subr.bf16.mxu0 %v939_v20  ;;  %v966_v62 = vld [vmem:[%s1223_s1 + $0x138] sm:$0xff]   ;;  %v31_v63 = vld [vmem:[%s1224_s0 + $0x20] sm:$0xff]  ;;  %v37_v0 = vld [vmem:[%s1224_s0 + $0x50] sm:$0xff] }
  0x15   :  { %841 = vmatpush3.bf16.msra.mxu1 %v938_v19  ;;  %v43_v1 = vpack.c.bf16 %v37_v0, %v31_v63  ;;  %v561_v2 = vld [vmem:[%s1225_s3] sm:$0xff]  ;;  %v562_v3 = vld [vmem:[%s1225_s3 + $0x8] sm:$0xff]  ;;  %v563_v5 = vld [vmem:[%s1225_s3 + $0x10] sm:$0xff] }
  0x16   :  { %842 = vmatprep.subr.bf16.mxu1 %v941_v22  ;;  %v907_v4 = vpack.c.bf16 %v562_v3, %v561_v2  ;;  %v655_v6 = vld [vmem:[%s1226_s5] sm:$0xff]  ;;  %v656_v7 = vld [vmem:[%s1226_s5 + $0x8] sm:$0xff]  ;;  %v657_v36 = vld [vmem:[%s1226_s5 + $0x10] sm:$0xff] }
  0x17   :  { %821 = vmatpush3.bf16.msra.mxu0 %v940_v21  ;;  %v911_v8 = vpack.c.bf16 %v656_v7, %v655_v6  ;;  %v755_v10 = vld [vmem:[%s1227_s2] ss:$0 sm:$0xff] }
  0x18   :  { %822 = vmatprep.subr.bf16.mxu0 %v943_v24  ;;  %v804_v39 = vld [vmem:[%s1228_s4] ss:$0 sm:$0xff] }
  0x19   :  { %843 = vmatpush3.bf16.msra.mxu1 %v942_v23 }
  0x1a   :  { %844 = vmatprep.subr.bf16.mxu1 %v945_v26 }
  0x1b   :  { %823 = vmatpush3.bf16.msra.mxu0 %v944_v25 }
  0x1c   :  { %824 = vmatprep.subr.bf16.mxu0 %v947_v28 }
  0x1d   :  { %845 = vmatpush3.bf16.msra.mxu1 %v946_v27 }
  0x1e   :  { %846 = vmatprep.subr.bf16.mxu1 %v949_v30 }
  0x1f   :  { %825 = vmatpush3.bf16.msra.mxu0 %v948_v29 }
  0x20   :  { %854 = vmatprep.subr.bf16.mxu0 %v951_v38 }
  0x21   :  { %847 = vmatpush3.bf16.msra.mxu1 %v950_v34 }
  0x22   :  { %469 = vmatmul.mubr.bf16.vlgmr.msra.gmra.mrb[0].mxu0 %v39_v37  ;;  %908 = vmatprep.subr.bf16.mxu1 %v907_v4  ;;  %v658_v37 = vld [vmem:[%s1226_s5 + $0x18] sm:$0xff] }
  0x23   :  { %855 = vmatpush3.bf16.msra.mxu0 %v952_v42  ;;  %550 = vmatprep.mubr.bf16.mxu0 %v44_v57  ;;  %v915_v38 = vpack.c.bf16 %v658_v37, %v657_v36 }
  0x24   :  { %510 = vmatmul.mubr.bf16.vlgmr.msra.gmra.mrb[0].mxu1 %v41_v45  ;;  %856 = vmatprep.subr.bf16.mxu0 %v953_v46  ;;  %v807_v46 = vld [vmem:[%s1229_s6] ss:$0 sm:$0xff] }
  0x25   :  { %910 = vmatpush3.bf16.msra.mxu1 %v907_v4 }
  0x26   :  { %891 = vmatprep.subr.mxu1 %v563_v5 }
  0x27   :  { %857 = vmatpush3.bf16.msra.mxu0 %v954_v47 }
  0x28   :  { %858 = vmatprep.subr.bf16.mxu0 %v955_v48 }
  0x29   :  { %892 = vmatpush3.msra.mxu1 %v563_v5 }
  0x2a   :  { %912 = vmatprep.subr.bf16.mxu1 %v911_v8 }
  0x2b   :  { %859 = vmatpush3.bf16.msra.mxu0 %v956_v49 }
  0x2c   :  { %860 = vmatprep.subr.bf16.mxu0 %v957_v50 }
  0x2f   :  { %861 = vmatpush3.bf16.msra.mxu0 %v958_v51 }
  0x30   :  { %862 = vmatprep.subr.bf16.mxu0 %v959_v52 }
  0x33   :  { %863 = vmatpush3.bf16.msra.mxu0 %v960_v53 }
  0x34   :  { %864 = vmatprep.subr.bf16.mxu0 %v961_v54 }
  0x37   :  { %865 = vmatpush3.bf16.msra.mxu0 %v962_v58 }
  0x38   :  { %866 = vmatprep.subr.bf16.mxu0 %v963_v59 }
  0x3b   :  { %867 = vmatpush3.bf16.msra.mxu0 %v964_v60 }
  0x3c   :  { %868 = vmatprep.subr.bf16.mxu0 %v965_v61 }
  0x3f   :  { %869 = vmatpush3.bf16.msra.mxu0 %v966_v62 }
  0x42   :  { %551 = vmatmul.mubr.bf16.vlgmr.msra.gmra.mrb[4].mxu0 %v43_v1 }
  0xf5   :  { %v826_v9 = vpop.f32.mrb[0].mxu0 }
  0xf6   :  { %v827_v11 = vpop.f32.mrb[1].mxu0 }
  0xf7   :  { %v828_v12 = vadd.f32 %v827_v11, %v826_v9  ;;  %v829_v13 = vpop.f32.mrb[2].mxu0  ;;  %v848_v14 = vpop.f32.mrb[0].mxu1 }
  0xf8   :  { %v830_v15 = vpop.f32.mrb[3].mxu0  ;;  %v849_v18 = vpop.f32.mrb[1].mxu1 }
  0xf9   :  { %v471_v16 = vadd.f32 %v828_v12, %v755_v10  ;;  %v831_v17 = vadd.f32 %v830_v15, %v829_v13  ;;  %v850_v19 = vadd.f32 %v849_v18, %v848_v14  ;;  %v851_v20 = vpop.f32.mrb[2].mxu1 }
  0xfa   :  { %v852_v22 = vpop.f32.mrb[3].mxu1 }
  0xfb   :  { %v474_v21 = vadd.f32 %v831_v17, %v755_v10  ;;  %v512_v23 = vadd.f32 %v850_v19, %v471_v16  ;;  %v853_v24 = vadd.f32 %v852_v22, %v851_v20 }
  0xfd   :  { %v515_v25 = vadd.f32 %v853_v24, %v474_v21 }
 0x115   :  { %v870_v26 = vpop.f32.mrb[4].mxu0 }
 0x116   :  { %v871_v27 = vpop.f32.mrb[5].mxu0 }
 0x117   :  { %v872_v28 = vadd.f32 %v871_v27, %v870_v26  ;;  %v873_v29 = vpop.f32.mrb[6].mxu0 }
 0x118   :  { %v874_v30 = vpop.f32.mrb[7].mxu0 }
 0x119   :  { %v553_v31 = vadd.f32 %v872_v28, %v512_v23  ;;  %v875_v32 = vadd.f32 %v874_v30, %v873_v29 }
 0x11b   :  { %v559_v33 = vmax.f32 %v553_v31, 0.0  ;;  %v556_v34 = vadd.f32 %v875_v32, %v515_v25 }
 0x11d   :  { %v560_v35 = vmax.f32 %v556_v34, 0.0  ;;  %893 = vmatprep.mubr.msk.f32.mxu1 %vm571_vm0, %v559_v33 }
 0x11f   :  { %894 = vmatmul.mubr.msk.f32.vlgmr.msra.gmra.mrb[4].mxu1 %vm571_vm0, %v560_v35 }
 0x120   :  { %914 = vmatpush3.bf16.msra.mxu1 %v911_v8 }
 0x121   :  { %916 = vmatprep.subr.bf16.mxu1 %v915_v38 }
 0x124   :  { %918 = vmatpush3.bf16.msra.mxu1 %v915_v38 }
 0x1f2   :  { %v895_v40 = vpop.f32.mrb[4].mxu1 }
 0x1f3   :  { %v650_v41 = vadd.f32 %v895_v40, %v804_v39  ;;  %v644_v42 = vpop.f32.mrb[5].mxu1 }
 0x1f4   :  { %v645_v43 = vadd.f32 %v804_v39, %v644_v42 }
 0x1f5   :  { %v654_v45 = vmax.f32 %v650_v41, 0.0 }
 0x1f6   :  { %v653_v44 = vmax.f32 %v645_v43, 0.0 }
 0x1f8   :  { %904 = vmatprep.mubr.msk.f32.mxu1 %vm666_vm1, %v653_v44 }
 0x1f9   :  { %905 = vmatmul.mubr.msk.f32.vlgmr.msra.gmra.mrb[6].mxu1 %vm666_vm1, %v654_v45 }
 0x2cc   :  { %v906_v47 = vpop.f32.mrb[6].mxu1 }
 0x2cd   :  { %v745_v48 = vadd.f32 %v906_v47, %v807_v46  ;;  %v739_v49 = vpop.f32.mrb[7].mxu1 }
 0x2ce   :  { %v740_v50 = vadd.f32 %v807_v46, %v739_v49 }
 0x2cf   :  { %750 = vst.msk [vmem:[%s1230_s7 + $0x8] sm:$0xff] %vm748_vm2, %v745_v48 }
 0x2d0   :  { %749 = vst.msk [vmem:[%s1230_s7] sm:$0xff] %vm748_vm2, %v740_v50 }

</bundles_post_ra>
